<compile_context>
chip_gen: v5e
topology: v5e:2x2
jax: 0.10.0
libtpu: 0.0.40
codegen_flags: <defaults>
</compile_context>

<pallas_src>
import math
import functools

import jax
import jax.numpy as jnp
from jax.experimental import pallas as pl
from jax.experimental.pallas import tpu as pltpu

LANES = 128        # TPU lane width; every slab row / activation is 128-lane dense
_BN_EPS = 1e-5


def _round_up(n, m):
    return ((n + m - 1) // m) * m


# --------------------------- parameter slab packing --------------------------

def pack_params(params, features, hidden, labels):
    """Pack all weights/biases/BN params into ONE (rows, 128) f32 slab.

    Every block is 128-lane dense and starts at an 8-aligned row, so the kernel
    only ever takes aligned, full-lane static slices.  Returns (slab, layout)
    with layout[name] = (row_start, num_rows) as static Python ints."""
    assert hidden <= LANES and labels <= LANES
    Fp = _round_up(features, LANES)          # x is lane-padded to Fp in the wrapper

    def mat_block(arr, nrows):
        r, c = arr.shape
        return jnp.zeros((nrows, LANES), jnp.float32).at[:r, :c].set(arr)

    blocks = [
        ("w1_rel",  mat_block(params["w1_rel"],  Fp)),
        ("w1_root", mat_block(params["w1_root"], Fp)),
        ("w2_rel",  mat_block(params["w2_rel"],  LANES)),
        ("w2_root", mat_block(params["w2_root"], LANES)),
        ("w3_rel",  mat_block(params["w3_rel"],  LANES)),
        ("w3_root", mat_block(params["w3_root"], LANES)),
        ("wl1",     mat_block(params["wl1"],     LANES)),
        ("wl2",     mat_block(params["wl2"],     LANES)),
        ("wl3",     mat_block(params["wl3"],     LANES)),
    ]

    layout, pieces, row = {}, [], 0
    for name, blk in blocks:
        layout[name] = (row, blk.shape[0])
        pieces.append(blk)
        row += blk.shape[0]

    vec_names = ["b1_rel", "b2_rel", "b3_rel",
                 "bn1_gamma", "bn1_beta", "bn2_gamma", "bn2_beta", "b_lin"]
    vec_block = jnp.zeros((_round_up(len(vec_names), 8), LANES), jnp.float32)
    for i, name in enumerate(vec_names):
        v = params[name].reshape(-1)
        vec_block = vec_block.at[i, :v.shape[0]].set(v)
        layout[name] = (row + i, 1)
    pieces.append(vec_block)

    return jnp.concatenate(pieces, axis=0), layout


# ----------------------------- Pallas kernel --------------------------------

def nodegnn_kernel(x_ref, a_ref, p_ref, out_ref, *, layout):
    def blk(name):                     # (rows, 128) lane-dense weight block, f32
        r0, nr = layout[name]
        return p_ref[r0:r0 + nr, :]

    def vec(name):                     # (1, 128) broadcastable vector (zero-padded)
        r0, _ = layout[name]
        return p_ref[r0:r0 + 1, :]

    A = a_ref[...]                     # (N, N) bf16 dense adjacency, A[dst, src]
    x = x_ref[...]                     # (N, Fp) f32, lane-padded node features

    def graph_conv(h, wr, wo, b):
        # PyG GraphConv: lin_rel(sum_j e_ji h_j) + lin_root(h_i)
        #   = A @ (h @ W_rel) + h @ W_root + b_rel
        msg = jnp.dot(h, blk(wr), preferred_element_type=jnp.float32)      # (N, 128)
        agg = jnp.dot(A, msg.astype(jnp.bfloat16),                         # bf16 MXU,
                      preferred_element_type=jnp.float32)                  # f32 acc
        root = jnp.dot(h, blk(wo), preferred_element_type=jnp.float32)
        return agg + root + vec(b)

    def batch_norm(h, gname, bname):
        # training-mode BatchNorm over nodes (biased variance, eps=1e-5);
        # padded lanes stay exactly 0 because gamma/beta pad-lanes are 0.
        mu = jnp.mean(h, axis=0, keepdims=True)
        var = jnp.mean((h - mu) ** 2, axis=0, keepdims=True)
        return (h - mu) * jax.lax.rsqrt(var + _BN_EPS) * vec(gname) + vec(bname)

    # dropout(p=0.0) == identity
    h1 = jnp.maximum(batch_norm(graph_conv(x,  "w1_rel", "w1_root", "b1_rel"),
                                "bn1_gamma", "bn1_beta"), 0.0)
    h2 = jnp.maximum(batch_norm(graph_conv(h1, "w2_rel", "w2_root", "b2_rel"),
                                "bn2_gamma", "bn2_beta"), 0.0)
    h3 = jnp.maximum(graph_conv(h2, "w3_rel", "w3_root", "b3_rel"), 0.0)

    # lin(concat([h1, h2, h3], axis=1)) as three partial matmuls into a
    # lane-dense (N, 128) output (unmasked vst); wrapper slices back to `labels`.
    out_ref[...] = (jnp.dot(h1, blk("wl1"), preferred_element_type=jnp.float32)
                    + jnp.dot(h2, blk("wl2"), preferred_element_type=jnp.float32)
                    + jnp.dot(h3, blk("wl3"), preferred_element_type=jnp.float32)
                    + vec("b_lin"))


# ------------------------------ JAX wrapper ----------------------------------

def _full_spec(shape):
    # whole-array block, grid of size 1
    return pl.BlockSpec(shape, lambda i: (0,) * len(shape))


@functools.partial(jax.jit, static_argnames=("num_nodes",))
def nodegnn_forward(x, edge_index, edge_weights, params, *, num_nodes):
    features = x.shape[1]
    hidden = params["w1_rel"].shape[1]
    labels = params["b_lin"].shape[-1]

    # Glue: densify the graph (scatter-add of edge weights), A[dst, src] = w.
    # bf16 halves the dominant O(N^2) operand and uses the fast bf16 MXU path.
    # TODO(synk): for realistic graph sizes keep the edge list (CSR offsets) and
    # gather via PrefetchScalarGridSpec instead of densifying (O(E*H) traffic).
    A = jnp.zeros((num_nodes, num_nodes), jnp.float32)
    A = A.at[edge_index[1], edge_index[0]].add(edge_weights)
    A = A.astype(jnp.bfloat16)

    # Lane-pad the node features so every in-kernel operand is 128-lane dense.
    Fp = _round_up(features, LANES)
    x_pad = jnp.zeros((num_nodes, Fp), jnp.float32).at[:, :features].set(x)

    slab, layout = pack_params(params, features, hidden, labels)

    kernel = functools.partial(nodegnn_kernel, layout=layout)
    out_padded = pl.pallas_call(
        kernel,
        out_shape=jax.ShapeDtypeStruct((num_nodes, LANES), jnp.float32),
        grid=(1,),
        in_specs=[_full_spec(x_pad.shape), _full_spec(A.shape), _full_spec(slab.shape)],
        out_specs=_full_spec((num_nodes, LANES)),
        compiler_params=pltpu.CompilerParams(
            dimension_semantics=("arbitrary",),
            vmem_limit_bytes=32 * 1024 * 1024),
    )(x_pad, A, slab)
    # TODO(synk): for v7x-scale graphs, tile the node axis as a "parallel" grid
    # dim (with a two-pass BN reduction) so both TensorCores are used.
    return out_padded[:, :labels]


# -------------------------- deterministic init -------------------------------

def xavier_uniform(key, fan_in, fan_out):
    # stored as [in, out] for right-multiplication (same bound as torch [out, in])
    bound = math.sqrt(6.0 / (fan_in + fan_out))
    return jax.random.uniform(key, (fan_in, fan_out), jnp.float32, -bound, bound)


def init_params(key, features, hidden, labels):
    ks = jax.random.split(key, 12)
    params = {
        # GraphConv layers: lin_rel (with bias) and lin_root (no bias)
        "w1_rel":  xavier_uniform(ks[0], features, hidden),
        "w1_root": xavier_uniform(ks[1], features, hidden),
        "b1_rel":  jax.random.uniform(ks[2], (1, hidden), jnp.float32,
                                      -1.0 / math.sqrt(features), 1.0 / math.sqrt(features)),
        "w2_rel":  xavier_uniform(ks[3], hidden, hidden),
        "w2_root": xavier_uniform(ks[4], hidden, hidden),
        "b2_rel":  jax.random.uniform(ks[5], (1, hidden), jnp.float32,
                                      -1.0 / math.sqrt(hidden), 1.0 / math.sqrt(hidden)),
        "w3_rel":  xavier_uniform(ks[6], hidden, hidden),
        "w3_root": xavier_uniform(ks[7], hidden, hidden),
        "b3_rel":  jax.random.uniform(ks[8], (1, hidden), jnp.float32,
                                      -1.0 / math.sqrt(hidden), 1.0 / math.sqrt(hidden)),
        # BatchNorm default affine params
        "bn1_gamma": jnp.ones((1, hidden), jnp.float32),
        "bn1_beta":  jnp.zeros((1, hidden), jnp.float32),
        "bn2_gamma": jnp.ones((1, hidden), jnp.float32),
        "bn2_beta":  jnp.zeros((1, hidden), jnp.float32),
        # final Linear on concat(3*hidden) -> labels, xavier weight, zero bias
        "b_lin": jnp.zeros((1, labels), jnp.float32),
    }
    wl = xavier_uniform(ks[9], 3 * hidden, labels)
    params["wl1"] = wl[0 * hidden:1 * hidden]
    params["wl2"] = wl[1 * hidden:2 * hidden]
    params["wl3"] = wl[2 * hidden:3 * hidden]
    return params


# ------------------------------- reference -----------------------------------

def reference_forward(x, edge_index, edge_weights, params, num_nodes):
    # Pure f32 reference faithful to the PyTorch module's math.
    A = jnp.zeros((num_nodes, num_nodes), jnp.float32)
    A = A.at[edge_index[1], edge_index[0]].add(edge_weights)

    def gc(h, wr, b, wo):
        return A @ h @ wr + b + h @ wo

    def bn(h, g, b):
        mu = h.mean(0, keepdims=True)
        var = ((h - mu) ** 2).mean(0, keepdims=True)
        return (h - mu) / jnp.sqrt(var + _BN_EPS) * g + b

    h1 = jnp.maximum(bn(gc(x, params["w1_rel"], params["b1_rel"], params["w1_root"]),
                        params["bn1_gamma"], params["bn1_beta"]), 0.0)
    h2 = jnp.maximum(bn(gc(h1, params["w2_rel"], params["b2_rel"], params["w2_root"]),
                        params["bn2_gamma"], params["bn2_beta"]), 0.0)
    h3 = jnp.maximum(gc(h2, params["w3_rel"], params["b3_rel"], params["w3_root"]), 0.0)
    emb = jnp.concatenate([h1, h2, h3], axis=1)
    w = jnp.concatenate([params["wl1"], params["wl2"], params["wl3"]], axis=0)
    return emb @ w + params["b_lin"]


# --------------------------------- main ---------------------------------------

if __name__ == "__main__":
    NUM_NODES, FEATURES, HIDDEN, LABELS, NUM_EDGES = 32, 16, 20, 4, 96

    key = jax.random.PRNGKey(0)
    k_x, k_src, k_dst, k_p = jax.random.split(key, 4)

    x = jax.random.normal(k_x, (NUM_NODES, FEATURES), jnp.float32)
    src = jax.random.randint(k_src, (NUM_EDGES,), 0, NUM_NODES)
    dst = jax.random.randint(k_dst, (NUM_EDGES,), 0, NUM_NODES)
    edge_index = jnp.stack([src, dst], axis=0)                 # [2, num_edges]
    edge_weights = jnp.ones((NUM_EDGES,), jnp.float32)         # default in forward()

    params = init_params(k_p, FEATURES, HIDDEN, LABELS)

    out = nodegnn_forward(x, edge_index, edge_weights, params, num_nodes=NUM_NODES)
    out = jax.block_until_ready(out)

    ref = reference_forward(x, edge_index, edge_weights, params, NUM_NODES)
    assert out.shape == (NUM_NODES, LABELS)
    # bf16 aggregation (adjacency + neighbor messages) introduces ~O(1e-2) drift
    # vs the pure-f32 reference; tolerance relaxed accordingly.
    assert jnp.allclose(out, ref, atol=5e-2, rtol=5e-2), "mismatch vs JAX reference"

    print("KERNEL_OK")
</pallas_src>

<mosaic_0001>
module attributes {stable_mosaic.version = 11 : i64} {
  func.func @nodegnn_kernel(%arg0: i32, %arg1: memref<32x128xf32, #tpu.memory_space<vmem>>, %arg2: memref<32x32xbf16, #tpu.memory_space<vmem>>, %arg3: memref<1160x128xf32, #tpu.memory_space<vmem>>, %arg4: memref<32x128xf32, #tpu.memory_space<vmem>>) attributes {dimension_semantics = [#tpu.dimension_semantics<arbitrary>], iteration_bounds = array<i64: 1>, scalar_prefetch = 0 : i64, scratch_operands = 0 : i64, tpu.core_type = #tpu.core_type<tc>, window_params = [{pipeline_mode = #tpu.pipeline_mode<synchronous>, transform_indices = @transform_0, window_bounds = array<i64: 32, 128>}, {pipeline_mode = #tpu.pipeline_mode<synchronous>, transform_indices = @transform_1, window_bounds = array<i64: 32, 32>}, {pipeline_mode = #tpu.pipeline_mode<synchronous>, transform_indices = @transform_2, window_bounds = array<i64: 1160, 128>}, {pipeline_mode = #tpu.pipeline_mode<synchronous>, transform_indices = @transform_3, window_bounds = array<i64: 32, 128>}]} {
    %c0 = arith.constant 0 : index
    %c0_0 = arith.constant 0 : index
    %0 = vector.load %arg2[%c0, %c0_0] : memref<32x32xbf16, #tpu.memory_space<vmem>>, vector<32x32xbf16>
    %c0_1 = arith.constant 0 : index
    %c0_2 = arith.constant 0 : index
    %1 = vector.load %arg1[%c0_1, %c0_2] : memref<32x128xf32, #tpu.memory_space<vmem>>, vector<32x128xf32>
    %c0_3 = arith.constant 0 : index
    %c0_4 = arith.constant 0 : index
    %2 = vector.load %arg3[%c0_3, %c0_4] : memref<1160x128xf32, #tpu.memory_space<vmem>>, vector<128x128xf32>
    %cst = arith.constant dense<0.000000e+00> : vector<32x128xf32>
    %3 = tpu.matmul %1, %2, %cst {dimension_numbers = #tpu.dot_dimension_numbers<[1], [0], [0], [1], [0, 0, 1, 1], [], []>} : vector<32x128xf32>, vector<128x128xf32>, vector<32x128xf32> -> vector<32x128xf32>
    %4 = arith.truncf %3 : vector<32x128xf32> to vector<32x128xbf16>
    %cst_5 = arith.constant dense<0.000000e+00> : vector<32x128xf32>
    %5 = tpu.matmul %0, %4, %cst_5 {dimension_numbers = #tpu.dot_dimension_numbers<[1], [0], [0], [1], [0, 0, 1, 1], [], []>} : vector<32x32xbf16>, vector<32x128xbf16>, vector<32x128xf32> -> vector<32x128xf32>
    %c128 = arith.constant 128 : index
    %c0_6 = arith.constant 0 : index
    %6 = vector.load %arg3[%c128, %c0_6] : memref<1160x128xf32, #tpu.memory_space<vmem>>, vector<128x128xf32>
    %cst_7 = arith.constant dense<0.000000e+00> : vector<32x128xf32>
    %7 = tpu.matmul %1, %6, %cst_7 {dimension_numbers = #tpu.dot_dimension_numbers<[1], [0], [0], [1], [0, 0, 1, 1], [], []>} : vector<32x128xf32>, vector<128x128xf32>, vector<32x128xf32> -> vector<32x128xf32>
    %8 = arith.addf %5, %7 : vector<32x128xf32>
    %c1152 = arith.constant 1152 : index
    %c0_8 = arith.constant 0 : index
    %9 = vector.load %arg3[%c1152, %c0_8] : memref<1160x128xf32, #tpu.memory_space<vmem>>, vector<1x128xf32>
    %10 = vector.broadcast %9 : vector<1x128xf32> to vector<32x128xf32>
    %11 = arith.addf %8, %10 : vector<32x128xf32>
    %cst_9 = arith.constant dense<0.000000e+00> : vector<128xf32>
    %12 = vector.multi_reduction <add>, %11, %cst_9 [0] : vector<32x128xf32> to vector<128xf32>
    %13 = vector.shape_cast %12 : vector<128xf32> to vector<1x128xf32>
    %cst_10 = arith.constant 3.200000e+01 : f32
    %14 = vector.broadcast %cst_10 : f32 to vector<1x128xf32>
    %15 = arith.divf %13, %14 : vector<1x128xf32>
    %16 = vector.broadcast %15 : vector<1x128xf32> to vector<32x128xf32>
    %17 = arith.subf %11, %16 : vector<32x128xf32>
    %18 = arith.mulf %17, %17 : vector<32x128xf32>
    %cst_11 = arith.constant dense<0.000000e+00> : vector<128xf32>
    %19 = vector.multi_reduction <add>, %18, %cst_11 [0] : vector<32x128xf32> to vector<128xf32>
    %20 = vector.shape_cast %19 : vector<128xf32> to vector<1x128xf32>
    %cst_12 = arith.constant 3.200000e+01 : f32
    %21 = vector.broadcast %cst_12 : f32 to vector<1x128xf32>
    %22 = arith.divf %20, %21 : vector<1x128xf32>
    %23 = vector.broadcast %15 : vector<1x128xf32> to vector<32x128xf32>
    %24 = arith.subf %11, %23 : vector<32x128xf32>
    %cst_13 = arith.constant 9.99999974E-6 : f32
    %25 = vector.broadcast %cst_13 : f32 to vector<1x128xf32>
    %26 = arith.addf %22, %25 : vector<1x128xf32>
    %27 = math.rsqrt %26 : vector<1x128xf32>
    %28 = vector.broadcast %27 : vector<1x128xf32> to vector<32x128xf32>
    %29 = arith.mulf %24, %28 : vector<32x128xf32>
    %c1155 = arith.constant 1155 : index
    %c0_14 = arith.constant 0 : index
    %30 = vector.load %arg3[%c1155, %c0_14] : memref<1160x128xf32, #tpu.memory_space<vmem>>, vector<1x128xf32>
    %31 = vector.broadcast %30 : vector<1x128xf32> to vector<32x128xf32>
    %32 = arith.mulf %29, %31 : vector<32x128xf32>
    %c1156 = arith.constant 1156 : index
    %c0_15 = arith.constant 0 : index
    %33 = vector.load %arg3[%c1156, %c0_15] : memref<1160x128xf32, #tpu.memory_space<vmem>>, vector<1x128xf32>
    %34 = vector.broadcast %33 : vector<1x128xf32> to vector<32x128xf32>
    %35 = arith.addf %32, %34 : vector<32x128xf32>
    %cst_16 = arith.constant 0.000000e+00 : f32
    %36 = vector.broadcast %cst_16 : f32 to vector<32x128xf32>
    %37 = arith.maximumf %35, %36 : vector<32x128xf32>
    %c256 = arith.constant 256 : index
    %c0_17 = arith.constant 0 : index
    %38 = vector.load %arg3[%c256, %c0_17] : memref<1160x128xf32, #tpu.memory_space<vmem>>, vector<128x128xf32>
    %cst_18 = arith.constant dense<0.000000e+00> : vector<32x128xf32>
    %39 = tpu.matmul %37, %38, %cst_18 {dimension_numbers = #tpu.dot_dimension_numbers<[1], [0], [0], [1], [0, 0, 1, 1], [], []>} : vector<32x128xf32>, vector<128x128xf32>, vector<32x128xf32> -> vector<32x128xf32>
    %40 = arith.truncf %39 : vector<32x128xf32> to vector<32x128xbf16>
    %cst_19 = arith.constant dense<0.000000e+00> : vector<32x128xf32>
    %41 = tpu.matmul %0, %40, %cst_19 {dimension_numbers = #tpu.dot_dimension_numbers<[1], [0], [0], [1], [0, 0, 1, 1], [], []>} : vector<32x32xbf16>, vector<32x128xbf16>, vector<32x128xf32> -> vector<32x128xf32>
    %c384 = arith.constant 384 : index
    %c0_20 = arith.constant 0 : index
    %42 = vector.load %arg3[%c384, %c0_20] : memref<1160x128xf32, #tpu.memory_space<vmem>>, vector<128x128xf32>
    %cst_21 = arith.constant dense<0.000000e+00> : vector<32x128xf32>
    %43 = tpu.matmul %37, %42, %cst_21 {dimension_numbers = #tpu.dot_dimension_numbers<[1], [0], [0], [1], [0, 0, 1, 1], [], []>} : vector<32x128xf32>, vector<128x128xf32>, vector<32x128xf32> -> vector<32x128xf32>
    %44 = arith.addf %41, %43 : vector<32x128xf32>
    %c1153 = arith.constant 1153 : index
    %c0_22 = arith.constant 0 : index
    %45 = vector.load %arg3[%c1153, %c0_22] : memref<1160x128xf32, #tpu.memory_space<vmem>>, vector<1x128xf32>
    %46 = vector.broadcast %45 : vector<1x128xf32> to vector<32x128xf32>
    %47 = arith.addf %44, %46 : vector<32x128xf32>
    %cst_23 = arith.constant dense<0.000000e+00> : vector<128xf32>
    %48 = vector.multi_reduction <add>, %47, %cst_23 [0] : vector<32x128xf32> to vector<128xf32>
    %49 = vector.shape_cast %48 : vector<128xf32> to vector<1x128xf32>
    %cst_24 = arith.constant 3.200000e+01 : f32
    %50 = vector.broadcast %cst_24 : f32 to vector<1x128xf32>
    %51 = arith.divf %49, %50 : vector<1x128xf32>
    %52 = vector.broadcast %51 : vector<1x128xf32> to vector<32x128xf32>
    %53 = arith.subf %47, %52 : vector<32x128xf32>
    %54 = arith.mulf %53, %53 : vector<32x128xf32>
    %cst_25 = arith.constant dense<0.000000e+00> : vector<128xf32>
    %55 = vector.multi_reduction <add>, %54, %cst_25 [0] : vector<32x128xf32> to vector<128xf32>
    %56 = vector.shape_cast %55 : vector<128xf32> to vector<1x128xf32>
    %cst_26 = arith.constant 3.200000e+01 : f32
    %57 = vector.broadcast %cst_26 : f32 to vector<1x128xf32>
    %58 = arith.divf %56, %57 : vector<1x128xf32>
    %59 = vector.broadcast %51 : vector<1x128xf32> to vector<32x128xf32>
    %60 = arith.subf %47, %59 : vector<32x128xf32>
    %cst_27 = arith.constant 9.99999974E-6 : f32
    %61 = vector.broadcast %cst_27 : f32 to vector<1x128xf32>
    %62 = arith.addf %58, %61 : vector<1x128xf32>
    %63 = math.rsqrt %62 : vector<1x128xf32>
    %64 = vector.broadcast %63 : vector<1x128xf32> to vector<32x128xf32>
    %65 = arith.mulf %60, %64 : vector<32x128xf32>
    %c1157 = arith.constant 1157 : index
    %c0_28 = arith.constant 0 : index
    %66 = vector.load %arg3[%c1157, %c0_28] : memref<1160x128xf32, #tpu.memory_space<vmem>>, vector<1x128xf32>
    %67 = vector.broadcast %66 : vector<1x128xf32> to vector<32x128xf32>
    %68 = arith.mulf %65, %67 : vector<32x128xf32>
    %c1158 = arith.constant 1158 : index
    %c0_29 = arith.constant 0 : index
    %69 = vector.load %arg3[%c1158, %c0_29] : memref<1160x128xf32, #tpu.memory_space<vmem>>, vector<1x128xf32>
    %70 = vector.broadcast %69 : vector<1x128xf32> to vector<32x128xf32>
    %71 = arith.addf %68, %70 : vector<32x128xf32>
    %cst_30 = arith.constant 0.000000e+00 : f32
    %72 = vector.broadcast %cst_30 : f32 to vector<32x128xf32>
    %73 = arith.maximumf %71, %72 : vector<32x128xf32>
    %c512 = arith.constant 512 : index
    %c0_31 = arith.constant 0 : index
    %74 = vector.load %arg3[%c512, %c0_31] : memref<1160x128xf32, #tpu.memory_space<vmem>>, vector<128x128xf32>
    %cst_32 = arith.constant dense<0.000000e+00> : vector<32x128xf32>
    %75 = tpu.matmul %73, %74, %cst_32 {dimension_numbers = #tpu.dot_dimension_numbers<[1], [0], [0], [1], [0, 0, 1, 1], [], []>} : vector<32x128xf32>, vector<128x128xf32>, vector<32x128xf32> -> vector<32x128xf32>
    %76 = arith.truncf %75 : vector<32x128xf32> to vector<32x128xbf16>
    %cst_33 = arith.constant dense<0.000000e+00> : vector<32x128xf32>
    %77 = tpu.matmul %0, %76, %cst_33 {dimension_numbers = #tpu.dot_dimension_numbers<[1], [0], [0], [1], [0, 0, 1, 1], [], []>} : vector<32x32xbf16>, vector<32x128xbf16>, vector<32x128xf32> -> vector<32x128xf32>
    %c640 = arith.constant 640 : index
    %c0_34 = arith.constant 0 : index
    %78 = vector.load %arg3[%c640, %c0_34] : memref<1160x128xf32, #tpu.memory_space<vmem>>, vector<128x128xf32>
    %cst_35 = arith.constant dense<0.000000e+00> : vector<32x128xf32>
    %79 = tpu.matmul %73, %78, %cst_35 {dimension_numbers = #tpu.dot_dimension_numbers<[1], [0], [0], [1], [0, 0, 1, 1], [], []>} : vector<32x128xf32>, vector<128x128xf32>, vector<32x128xf32> -> vector<32x128xf32>
    %80 = arith.addf %77, %79 : vector<32x128xf32>
    %c1154 = arith.constant 1154 : index
    %c0_36 = arith.constant 0 : index
    %81 = vector.load %arg3[%c1154, %c0_36] : memref<1160x128xf32, #tpu.memory_space<vmem>>, vector<1x128xf32>
    %82 = vector.broadcast %81 : vector<1x128xf32> to vector<32x128xf32>
    %83 = arith.addf %80, %82 : vector<32x128xf32>
    %cst_37 = arith.constant 0.000000e+00 : f32
    %84 = vector.broadcast %cst_37 : f32 to vector<32x128xf32>
    %85 = arith.maximumf %83, %84 : vector<32x128xf32>
    %c768 = arith.constant 768 : index
    %c0_38 = arith.constant 0 : index
    %86 = vector.load %arg3[%c768, %c0_38] : memref<1160x128xf32, #tpu.memory_space<vmem>>, vector<128x128xf32>
    %cst_39 = arith.constant dense<0.000000e+00> : vector<32x128xf32>
    %87 = tpu.matmul %37, %86, %cst_39 {dimension_numbers = #tpu.dot_dimension_numbers<[1], [0], [0], [1], [0, 0, 1, 1], [], []>} : vector<32x128xf32>, vector<128x128xf32>, vector<32x128xf32> -> vector<32x128xf32>
    %c896 = arith.constant 896 : index
    %c0_40 = arith.constant 0 : index
    %88 = vector.load %arg3[%c896, %c0_40] : memref<1160x128xf32, #tpu.memory_space<vmem>>, vector<128x128xf32>
    %cst_41 = arith.constant dense<0.000000e+00> : vector<32x128xf32>
    %89 = tpu.matmul %73, %88, %cst_41 {dimension_numbers = #tpu.dot_dimension_numbers<[1], [0], [0], [1], [0, 0, 1, 1], [], []>} : vector<32x128xf32>, vector<128x128xf32>, vector<32x128xf32> -> vector<32x128xf32>
    %90 = arith.addf %87, %89 : vector<32x128xf32>
    %c1024 = arith.constant 1024 : index
    %c0_42 = arith.constant 0 : index
    %91 = vector.load %arg3[%c1024, %c0_42] : memref<1160x128xf32, #tpu.memory_space<vmem>>, vector<128x128xf32>
    %cst_43 = arith.constant dense<0.000000e+00> : vector<32x128xf32>
    %92 = tpu.matmul %85, %91, %cst_43 {dimension_numbers = #tpu.dot_dimension_numbers<[1], [0], [0], [1], [0, 0, 1, 1], [], []>} : vector<32x128xf32>, vector<128x128xf32>, vector<32x128xf32> -> vector<32x128xf32>
    %93 = arith.addf %90, %92 : vector<32x128xf32>
    %c1159 = arith.constant 1159 : index
    %c0_44 = arith.constant 0 : index
    %94 = vector.load %arg3[%c1159, %c0_44] : memref<1160x128xf32, #tpu.memory_space<vmem>>, vector<1x128xf32>
    %95 = vector.broadcast %94 : vector<1x128xf32> to vector<32x128xf32>
    %96 = arith.addf %93, %95 : vector<32x128xf32>
    %c0_45 = arith.constant 0 : index
    %c0_46 = arith.constant 0 : index
    %97 = vector.load %arg4[%c0_45, %c0_46] : memref<32x128xf32, #tpu.memory_space<vmem>>, vector<32x128xf32>
    tpu.vector_store %arg4[%c0_45, %c0_46], %96 {strides = array<i32>} : memref<32x128xf32, #tpu.memory_space<vmem>>, vector<32x128xf32>,
    return
  }
  func.func @transform_0(%arg0: i32) -> (i32, i32) {
    %c0_i32 = arith.constant 0 : i32
    %c0_i32_0 = arith.constant 0 : i32
    %c0_i32_1 = arith.constant 0 : i32
    return %c0_i32, %c0_i32_0 : i32, i32
  }
  func.func @transform_1(%arg0: i32) -> (i32, i32) {
    %c0_i32 = arith.constant 0 : i32
    %c0_i32_0 = arith.constant 0 : i32
    %c0_i32_1 = arith.constant 0 : i32
    return %c0_i32, %c0_i32_0 : i32, i32
  }
  func.func @transform_2(%arg0: i32) -> (i32, i32) {
    %c0_i32 = arith.constant 0 : i32
    %c0_i32_0 = arith.constant 0 : i32
    %c0_i32_1 = arith.constant 0 : i32
    return %c0_i32, %c0_i32_0 : i32, i32
  }
  func.func @transform_3(%arg0: i32) -> (i32, i32) {
    %c0_i32 = arith.constant 0 : i32
    %c0_i32_0 = arith.constant 0 : i32
    %c0_i32_1 = arith.constant 0 : i32
    return %c0_i32, %c0_i32_0 : i32, i32
  }
}

</mosaic_0001>

<bundles_post_ra>
// kernel: nodegnn_forward.1
= control target key start
LH: loop header
LB: loop body
LE: loop exit
PB: predicated region body
PF: predicated region fallthrough
CT: control target
= control target key end

     0   :  { %vm125_vm0 = vcmask 261120   ;;  %v704_v49 = vmov 32.0   ;;  %s1293_s2 = inlined_call_operand.vmem [shape: f32[1160,128], index: 2, kind: input, shape index: {}]   ;;  %s1294_s0 = inlined_call_operand.vmem [shape: f32[32,128], index: 0, kind: input, shape index: {}]   ;;  %s1295_s1 = inlined_call_operand.vmem [shape: bf16[32,32], index: 1, kind: input, shape index: {}]   ;;  %s1296_s3 = inlined_call_operand.vmem [shape: f32[32,128], index: 3, kind: output, shape index: {}]  }
   0x1   :  { %v38_v0 = vld [vmem:[%s1293_s2 + $0x78] sm:$0xff]  ;;  %v37_v1 = vld [vmem:[%s1293_s2 + $0x70] sm:$0xff]  ;;  %v36_v2 = vld [vmem:[%s1293_s2 + $0x68] sm:$0xff]  ;;  %698 = vrcp.f32 %v704_v49 }
   0x2   :  { %39 = vmatpush.msra.mxu0 %v38_v0  ;;  %v35_v3 = vld [vmem:[%s1293_s2 + $0x60] sm:$0xff]  ;;  %v34_v4 = vld [vmem:[%s1293_s2 + $0x58] sm:$0xff]  ;;  %v33_v5 = vld [vmem:[%s1293_s2 + $0x50] sm:$0xff] }
   0x3   :  { %v32_v6 = vld [vmem:[%s1293_s2 + $0x48] sm:$0xff]  ;;  %v31_v7 = vld [vmem:[%s1293_s2 + $0x40] sm:$0xff]  ;;  %v30_v8 = vld [vmem:[%s1293_s2 + $0x38] sm:$0xff] }
   0x4   :  { %40 = vmatpush.msra.mxu0 %v37_v1  ;;  %v29_v9 = vld [vmem:[%s1293_s2 + $0x30] sm:$0xff]  ;;  %v28_v10 = vld [vmem:[%s1293_s2 + $0x28] sm:$0xff]  ;;  %v27_v11 = vld [vmem:[%s1293_s2 + $0x20] sm:$0xff] }
   0x5   :  { %v26_v12 = vld [vmem:[%s1293_s2 + $0x18] sm:$0xff]  ;;  %v25_v13 = vld [vmem:[%s1293_s2 + $0x10] sm:$0xff]  ;;  %v24_v14 = vld [vmem:[%s1293_s2 + $0x8] sm:$0xff] }
   0x6   :  { %41 = vmatpush.msra.mxu0 %v36_v2  ;;  %v23_v15 = vld [vmem:[%s1293_s2] sm:$0xff]  ;;  %v20_v17 = vld [vmem:[%s1294_s0 + $0x8] sm:$0xff]  ;;  %v21_v18 = vld [vmem:[%s1294_s0 + $0x10] sm:$0xff] }
   0x7   :  { %v19_v16 = vld [vmem:[%s1294_s0] sm:$0xff]  ;;  %v22_v19 = vld [vmem:[%s1294_s0 + $0x18] sm:$0xff]  ;;  %v84_v21 = vld [vmem:[%s1293_s2 + $0xf0] sm:$0xff]  ;;  %v699_v55 = vpop.eup %698 }
   0x8   :  { %42 = vmatpush.msra.mxu0 %v35_v3  ;;  %v85_v20 = vld [vmem:[%s1293_s2 + $0xf8] sm:$0xff]  ;;  %v83_v22 = vld [vmem:[%s1293_s2 + $0xe8] sm:$0xff]  ;;  %v82_v23 = vld [vmem:[%s1293_s2 + $0xe0] sm:$0xff]  ;;  %v167_v61 = vmul.f32 32.0, %v699_v55  ;;  %vm171_vm1 = vweird.f32 %v699_v55 }
   0x9   :  { %86 = vmatpush.msra.mxu1 %v85_v20  ;;  %v81_v24 = vld [vmem:[%s1293_s2 + $0xd8] sm:$0xff]  ;;  %v80_v25 = vld [vmem:[%s1293_s2 + $0xd0] sm:$0xff]  ;;  %v79_v26 = vld [vmem:[%s1293_s2 + $0xc8] sm:$0xff] }
   0xa   :  { %43 = vmatpush.msra.mxu0 %v34_v4  ;;  %v78_v27 = vld [vmem:[%s1293_s2 + $0xc0] sm:$0xff]  ;;  %v77_v28 = vld [vmem:[%s1293_s2 + $0xb8] sm:$0xff]  ;;  %v76_v29 = vld [vmem:[%s1293_s2 + $0xb0] sm:$0xff]  ;;  %v168_v2 = vsub.f32 1.0, %v167_v61 }
   0xb   :  { %87 = vmatpush.msra.mxu1 %v84_v21  ;;  %v75_v30 = vld [vmem:[%s1293_s2 + $0xa8] sm:$0xff]  ;;  %v74_v31 = vld [vmem:[%s1293_s2 + $0xa0] sm:$0xff]  ;;  %v73_v32 = vld [vmem:[%s1293_s2 + $0x98] sm:$0xff] }
   0xc   :  { %44 = vmatpush.msra.mxu0 %v33_v5  ;;  %v72_v34 = vld [vmem:[%s1293_s2 + $0x90] sm:$0xff]  ;;  %v71_v35 = vld [vmem:[%s1293_s2 + $0x88] sm:$0xff]  ;;  %v70_v36 = vld [vmem:[%s1293_s2 + $0x80] sm:$0xff]  ;;  %v169_v5 = vmul.f32 %v699_v55, %v168_v2 }
   0xd   :  { %88 = vmatpush.msra.mxu1 %v83_v22  ;;  %v836_v42 = vld [vmem:[%s1295_s1] sm:$0xff]  ;;  %v843_v43 = vld [vmem:[%s1295_s1 + $0x8] sm:$0xff]  ;;  %v234_v21 = vld [vmem:[%s1293_s2 + $0x158] sm:$0xff] }
   0xe   :  { %45 = vmatpush.msra.mxu0 %v32_v6  ;;  %v690_v53 = vld [vmem:[%s1293_s2 + $0x480] ss:$0 sm:$0xff]  ;;  %v281_v22 = vld [vmem:[%s1293_s2 + $0x1d8] sm:$0xff] }
   0xf   :  { %89 = vmatpush.msra.mxu1 %v82_v23  ;;  %v223_v61 = vld [vmem:[%s1293_s2 + $0x100] sm:$0xff] }
  0x10   :  { %46 = vmatpush.msra.mxu0 %v31_v7  ;;  %v238_v7 = vld [vmem:[%s1293_s2 + $0x178] sm:$0xff] }
  0x11   :  { %90 = vmatpush.msra.mxu1 %v81_v24  ;;  %239 = vmatpush.msra.mxu3 %v238_v7  ;;  %v233_v24 = vld [vmem:[%s1293_s2 + $0x150] sm:$0xff] }
  0x12   :  { %47 = vmatpush.msra.mxu0 %v30_v8  ;;  %v285_v8 = vld [vmem:[%s1293_s2 + $0x1f8] sm:$0xff] }
  0x13   :  { %91 = vmatpush.msra.mxu1 %v80_v25  ;;  %v280_v25 = vld [vmem:[%s1293_s2 + $0x1d0] sm:$0xff] }
  0x14   :  { %48 = vmatpush.msra.mxu0 %v29_v9 }
  0x15   :  { %92 = vmatpush.msra.mxu1 %v79_v26 }
  0x16   :  { %49 = vmatpush.msra.mxu0 %v28_v10  ;;  %v237_v10 = vld [vmem:[%s1293_s2 + $0x170] sm:$0xff] }
  0x17   :  { %93 = vmatpush.msra.mxu1 %v78_v27  ;;  %240 = vmatpush.msra.mxu3 %v237_v10 }
  0x18   :  { %50 = vmatpush.msra.mxu0 %v27_v11  ;;  %v284_v11 = vld [vmem:[%s1293_s2 + $0x1f0] sm:$0xff] }
  0x19   :  { %94 = vmatpush.msra.mxu1 %v77_v28 }
  0x1a   :  { %51 = vmatpush.msra.mxu0 %v26_v12  ;;  %v170_v12 = vadd.f32 %v699_v55, %v169_v5 }
  0x1b   :  { %95 = vmatpush.msra.mxu1 %v76_v29  ;;  %v232_v29 = vld [vmem:[%s1293_s2 + $0x148] sm:$0xff] }
  0x1c   :  { %52 = vmatpush.msra.mxu0 %v25_v13 }
  0x1d   :  { %96 = vmatpush.msra.mxu1 %v75_v30  ;;  %v279_v30 = vld [vmem:[%s1293_s2 + $0x1c8] sm:$0xff] }
  0x1e   :  { %53 = vmatpush.msra.mxu0 %v24_v14  ;;  %v236_v14 = vld [vmem:[%s1293_s2 + $0x168] sm:$0xff] }
  0x1f   :  { %97 = vmatpush.msra.mxu1 %v74_v31  ;;  %241 = vmatpush.msra.mxu3 %v236_v14 }
  0x20   :  { %54 = vmatpush.msra.mxu0 %v23_v15  ;;  %v283_v15 = vld [vmem:[%s1293_s2 + $0x1e8] sm:$0xff] }
  0x21   :  { %55 = vmatmul.f32.vlgmr.msra.gmra.mxu0 %v19_v16  ;;  %98 = vmatpush.msra.mxu1 %v73_v32 }
  0x23   :  { %99 = vmatpush.msra.mxu1 %v72_v34  ;;  %v231_v34 = vld [vmem:[%s1293_s2 + $0x140] sm:$0xff] }
  0x25   :  { %100 = vmatpush.msra.mxu1 %v71_v35  ;;  %v278_v35 = vld [vmem:[%s1293_s2 + $0x1c0] sm:$0xff] }
  0x27   :  { %101 = vmatpush.msra.mxu1 %v70_v36 }
  0x28   :  { %102 = vmatmul.f32.vlgmr.msra.gmra.mxu1 %v19_v16 }
  0x29   :  { %58 = vmatmul.f32.gmra.mxu0 %v20_v17 }
  0x30   :  { %105 = vmatmul.f32.gmra.mxu1 %v20_v17  ;;  %v235_v17 = vld [vmem:[%s1293_s2 + $0x160] sm:$0xff] }
  0x31   :  { %61 = vmatmul.f32.gmra.mxu0 %v21_v18  ;;  %242 = vmatpush.msra.mxu3 %v235_v17 }
  0x33   :  { %243 = vmatpush.msra.mxu3 %v234_v21 }
  0x35   :  { %244 = vmatpush.msra.mxu3 %v233_v24 }
  0x37   :  { %245 = vmatpush.msra.mxu3 %v232_v29 }
  0x38   :  { %108 = vmatmul.f32.gmra.mxu1 %v21_v18  ;;  %v282_v18 = vld [vmem:[%s1293_s2 + $0x1e0] sm:$0xff] }
  0x39   :  { %64 = vmatmul.f32.gmra.mxu0 %v22_v19  ;;  %246 = vmatpush.msra.mxu3 %v231_v34 }
  0x40   :  { %111 = vmatmul.f32.gmra.mxu1 %v22_v19  ;;  %v874_v19 = vsel %vm171_vm1, %v699_v55, %v170_v12  ;;  %v225_v55 = vld [vmem:[%s1293_s2 + $0x110] sm:$0xff]  ;;  %v692_v12 = vld [vmem:[%s1293_s2 + $0x484] ss:$0 sm:$0xff] }
  0x9e   :  { %v56_v33 = vpop.f32.mrf.mxu0 }
  0xa5   :  { %v103_v44 = vpop.f32.mrf.mxu1 }
  0xa6   :  { %v59_v37 = vpop.f32.mrf.mxu0 }
  0xa7   :  { %v68_v41 = vpack.c.bf16 %v59_v37, %v56_v33 }
  0xad   :  { %v106_v46 = vpop.f32.mrf.mxu1 }
  0xae   :  { %v62_v38 = vpop.f32.mrf.mxu0 }
  0xb5   :  { %v109_v48 = vpop.f32.mrf.mxu1 }
  0xb6   :  { %v65_v39 = vpop.f32.mrf.mxu0 }
  0xb7   :  { %v69_v40 = vpack.c.bf16 %v65_v39, %v62_v38  ;;  %v230_v38 = vld [vmem:[%s1293_s2 + $0x138] sm:$0xff] }
  0xb8   :  { %v277_v39 = vld [vmem:[%s1293_s2 + $0x1b8] sm:$0xff]  ;;  %247 = vmatpush.msra.mxu3 %v230_v38 }
  0xb9   :  { %138 = vmatpush.bf16.msra.mxu2 %v69_v40 }
  0xbd   :  { %139 = vmatpush.bf16.msra.mxu2 %v68_v41  ;;  %v112_v57 = vpop.f32.mrf.mxu1 }
  0xc0   :  { %681 = vmatmul.msk.bf16.vlgmr.msra.gmra.mxu2 %vm125_vm0, %v836_v42 }
  0xc1   :  { %286 = vmatpush.msrb.mxu2 %v285_v8 }
  0xc3   :  { %287 = vmatpush.msrb.mxu2 %v284_v11 }
  0xc5   :  { %288 = vmatpush.msrb.mxu2 %v283_v15 }
  0xc7   :  { %289 = vmatpush.msrb.mxu2 %v282_v18 }
  0xc9   :  { %290 = vmatpush.msrb.mxu2 %v281_v22 }
  0xcb   :  { %291 = vmatpush.msrb.mxu2 %v280_v25 }
  0xcd   :  { %292 = vmatpush.msrb.mxu2 %v279_v30 }
  0xcf   :  { %293 = vmatpush.msrb.mxu2 %v278_v35 }
  0xd0   :  { %682 = vmatmul.msk.bf16.gmra.mxu2 %vm125_vm0, %v843_v43 }
  0xd1   :  { %294 = vmatpush.msrb.mxu2 %v277_v39 }
 0x143   :  { %v141_v45 = vpop.f32.mrf.mxu2 }
 0x144   :  { %v142_v52 = vadd.f32 %v141_v45, %v103_v44  ;;  %v229_v44 = vld [vmem:[%s1293_s2 + $0x130] sm:$0xff] }
 0x145   :  { %v276_v45 = vld [vmem:[%s1293_s2 + $0x1b0] sm:$0xff]  ;;  %248 = vmatpush.msra.mxu3 %v229_v44 }
 0x146   :  { %v153_v58 = vadd.f32 %v690_v53, %v142_v52  ;;  %295 = vmatpush.msrb.mxu2 %v276_v45  ;;  %v693_v45 = vld [vmem:[%s1293_s2 + $0x481] ss:$0 sm:$0xff] }
 0x14b   :  { %v143_v47 = vpop.f32.mrf.mxu2 }
 0x14c   :  { %v144_v51 = vadd.f32 %v143_v47, %v106_v46  ;;  %v228_v47 = vld [vmem:[%s1293_s2 + $0x128] sm:$0xff] }
 0x14d   :  { %249 = vmatpush.msra.mxu3 %v228_v47 }
 0x14e   :  { %v154_v56 = vadd.f32 %v690_v53, %v144_v51  ;;  %v274_v51 = vld [vmem:[%s1293_s2 + $0x1a0] sm:$0xff] }
 0x150   :  { %v157_v62 = vadd.f32 %v154_v56, %v153_v58 }
 0x153   :  { %v146_v50 = vpop.f32.mrf.mxu2 }
 0x154   :  { %v147_v54 = vadd.f32 %v146_v50, %v109_v48  ;;  %v275_v48 = vld [vmem:[%s1293_s2 + $0x1a8] sm:$0xff]  ;;  %v227_v50 = vld [vmem:[%s1293_s2 + $0x120] sm:$0xff] }
 0x155   :  { %296 = vmatpush.msrb.mxu2 %v275_v48  ;;  %250 = vmatpush.msra.mxu3 %v227_v50 }
 0x156   :  { %v155_v59 = vadd.f32 %v690_v53, %v147_v54  ;;  %v273_v54 = vld [vmem:[%s1293_s2 + $0x198] sm:$0xff] }
 0x157   :  { %297 = vmatpush.msrb.mxu2 %v274_v51 }
 0x158   :  { %v158_v0 = vadd.f32 %v157_v62, %v155_v59  ;;  %v270_v62 = vld [vmem:[%s1293_s2 + $0x180] sm:$0xff] }
 0x159   :  { %298 = vmatpush.msrb.mxu2 %v273_v54 }
 0x15b   :  { %v148_v60 = vpop.f32.mrf.mxu2 }
 0x15c   :  { %v149_v63 = vadd.f32 %v148_v60, %v112_v57 }
 0x15e   :  { %v156_v1 = vadd.f32 %v690_v53, %v149_v63  ;;  %v226_v53 = vld [vmem:[%s1293_s2 + $0x118] sm:$0xff] }
 0x15f   :  { %251 = vmatpush.msra.mxu3 %v226_v53 }
 0x160   :  { %v159_v3 = vadd.f32 %v158_v0, %v156_v1 }
 0x161   :  { %252 = vmatpush.msra.mxu3 %v225_v55 }
 0x162   :  { %v160_v4 = vrot.slane %v159_v3, 4 }
 0x164   :  { %v161_v6 = vadd.f32 %v160_v4, %v159_v3 }
 0x166   :  { %v162_v9 = vrot.slane %v161_v6, 2 }
 0x168   :  { %v163_v13 = vadd.f32 %v162_v9, %v161_v6  ;;  %v691_v9 = vld [vmem:[%s1293_s2 + $0x483] ss:$0 sm:$0xff] }
 0x16a   :  { %v164_v16 = vrot.slane %v163_v13, 1 }
 0x16c   :  { %v165_v20 = vadd.f32 %v164_v16, %v163_v13 }
 0x16e   :  { %v173_v23 = vmul.f32 %v874_v19, %v165_v20 }
 0x170   :  { %v889_v26 = vsub.f32 %v153_v58, %v173_v23  ;;  %v891_v27 = vsub.f32 %v154_v56, %v173_v23  ;;  %v893_v28 = vsub.f32 %v155_v59, %v173_v23  ;;  %v901_v31 = vsub.f32 %v156_v1, %v173_v23  ;;  %v272_v56 = vld [vmem:[%s1293_s2 + $0x190] sm:$0xff]  ;;  %v224_v58 = vld [vmem:[%s1293_s2 + $0x108] sm:$0xff] }
 0x171   :  { %v271_v59 = vld [vmem:[%s1293_s2 + $0x188] sm:$0xff]  ;;  %299 = vmatpush.msrb.mxu2 %v272_v56  ;;  %253 = vmatpush.msra.mxu3 %v224_v58 }
 0x172   :  { %v178_v32 = vmul.f32 %v889_v26, %v889_v26  ;;  %v179_v33 = vmul.f32 %v891_v27, %v891_v27  ;;  %v180_v36 = vmul.f32 %v893_v28, %v893_v28  ;;  %v181_v40 = vmul.f32 %v901_v31, %v901_v31 }
 0x173   :  { %300 = vmatpush.msrb.mxu2 %v271_v59  ;;  %254 = vmatpush.msra.mxu3 %v223_v61  ;;  %v414_v59 = vld [vmem:[%s1293_s2 + $0x278] sm:$0xff] }
 0x174   :  { %v182_v37 = vadd.f32 %v179_v33, %v178_v32  ;;  %v551_v61 = vld [vmem:[%s1293_s2 + $0x3f8] sm:$0xff]  ;;  %415 = vmatpush.msrb.mxu1 %v414_v59  ;;  %v401_v59 = vld [vmem:[%s1293_s2 + $0x210] sm:$0xff] }
 0x175   :  { %301 = vmatpush.msrb.mxu2 %v270_v62 }
 0x176   :  { %v183_v41 = vadd.f32 %v182_v37, %v180_v36 }
 0x178   :  { %v184_v46 = vadd.f32 %v183_v41, %v181_v40 }
 0x17a   :  { %v185_v49 = vrot.slane %v184_v46, 4 }
 0x17c   :  { %v186_v52 = vadd.f32 %v185_v49, %v184_v46 }
 0x17e   :  { %v187_v57 = vrot.slane %v186_v52, 2 }
 0x180   :  { %v188_v60 = vadd.f32 %v187_v57, %v186_v52 }
 0x182   :  { %v189_v63 = vrot.slane %v188_v60, 1 }
 0x184   :  { %v190_v0 = vadd.f32 %v189_v63, %v188_v60  ;;  %v461_v60 = vld [vmem:[%s1293_s2 + $0x2f8] sm:$0xff]  ;;  %v413_v63 = vld [vmem:[%s1293_s2 + $0x270] sm:$0xff] }
 0x185   :  { %462 = vmatpush.msrb.mxu3 %v461_v60  ;;  %416 = vmatpush.msrb.mxu1 %v413_v63  ;;  %v448_v60 = vld [vmem:[%s1293_s2 + $0x290] sm:$0xff]  ;;  %v400_v63 = vld [vmem:[%s1293_s2 + $0x208] sm:$0xff] }
 0x186   :  { %v191_v1 = vmul.f32 %v190_v0, %v874_v19  ;;  %v460_v0 = vld [vmem:[%s1293_s2 + $0x2f0] sm:$0xff] }
 0x187   :  { %463 = vmatpush.msrb.mxu3 %v460_v0  ;;  %v447_v0 = vld [vmem:[%s1293_s2 + $0x288] sm:$0xff] }
 0x188   :  { %v192_v2 = vadd.f32 1e-05, %v191_v1  ;;  %v550_v1 = vld [vmem:[%s1293_s2 + $0x3f0] sm:$0xff] }
 0x18a   :  { %700 = vrsqrt.f32 %v192_v2  ;;  %vm199_vm3 = vweird.f32 %v192_v2 }
 0x190   :  { %v701_v3 = vpop.eup %700 }
 0x191   :  { %v194_v4 = vmul.f32 %v701_v3, %v192_v2  ;;  %vm200_vm2 = vweird.f32 %v701_v3 }
 0x192   :  { %vm201_vm4 = vmor %vm199_vm3, %vm200_vm2 }
 0x193   :  { %v195_v5 = vmul.f32 %v701_v3, %v194_v4  ;;  %v459_v4 = vld [vmem:[%s1293_s2 + $0x2e8] sm:$0xff] }
 0x194   :  { %464 = vmatpush.msrb.mxu3 %v459_v4  ;;  %v446_v4 = vld [vmem:[%s1293_s2 + $0x280] sm:$0xff] }
 0x195   :  { %v196_v6 = vmul.f32 0.5, %v195_v5  ;;  %v549_v5 = vld [vmem:[%s1293_s2 + $0x3e8] sm:$0xff] }
 0x197   :  { %v197_v7 = vsub.f32 1.5, %v196_v6 }
 0x199   :  { %v198_v8 = vmul.f32 %v701_v3, %v197_v7  ;;  %v411_v7 = vld [vmem:[%s1293_s2 + $0x260] sm:$0xff] }
 0x19b   :  { %v202_v10 = vsel %vm201_vm4, %v701_v3, %v198_v8  ;;  %v412_v3 = vld [vmem:[%s1293_s2 + $0x268] sm:$0xff]  ;;  %v458_v8 = vld [vmem:[%s1293_s2 + $0x2e0] sm:$0xff] }
 0x19c   :  { %v203_v11 = vmul.f32 %v202_v10, %v889_v26  ;;  %v204_v14 = vmul.f32 %v202_v10, %v891_v27  ;;  %v205_v20 = vmul.f32 %v202_v10, %v893_v28  ;;  %v206_v23 = vmul.f32 %v202_v10, %v901_v31  ;;  %417 = vmatpush.msrb.mxu1 %v412_v3  ;;  %v399_v3 = vld [vmem:[%s1293_s2 + $0x200] sm:$0xff] }
 0x19d   :  { %465 = vmatpush.msrb.mxu3 %v458_v8  ;;  %v535_v8 = vld [vmem:[%s1293_s2 + $0x378] sm:$0xff] }
 0x19e   :  { %v209_v13 = vmul.f32 %v691_v9, %v203_v11  ;;  %v210_v17 = vmul.f32 %v691_v9, %v204_v14  ;;  %v211_v22 = vmul.f32 %v691_v9, %v205_v20  ;;  %v212_v26 = vmul.f32 %v691_v9, %v206_v23  ;;  %v548_v9 = vld [vmem:[%s1293_s2 + $0x3e0] sm:$0xff]  ;;  %418 = vmatpush.msrb.mxu1 %v411_v7  ;;  %v410_v11 = vld [vmem:[%s1293_s2 + $0x258] sm:$0xff] }
 0x1a0   :  { %v215_v15 = vadd.f32 %v692_v12, %v209_v13  ;;  %v216_v18 = vadd.f32 %v692_v12, %v210_v17  ;;  %v217_v24 = vadd.f32 %v692_v12, %v211_v22  ;;  %v218_v27 = vadd.f32 %v692_v12, %v212_v26  ;;  %v457_v12 = vld [vmem:[%s1293_s2 + $0x2d8] sm:$0xff]  ;;  %419 = vmatpush.msrb.mxu1 %v410_v11  ;;  %v456_v17 = vld [vmem:[%s1293_s2 + $0x2d0] sm:$0xff]  ;;  %v455_v26 = vld [vmem:[%s1293_s2 + $0x2c8] sm:$0xff] }
 0x1a1   :  { %v547_v13 = vld [vmem:[%s1293_s2 + $0x3d8] sm:$0xff]  ;;  %466 = vmatpush.msrb.mxu3 %v457_v12  ;;  %v533_v11 = vld [vmem:[%s1293_s2 + $0x368] sm:$0xff] }
 0x1a2   :  { %v974_v16 = vmax.f32 %v215_v15, 0.0  ;;  %v979_v21 = vmax.f32 %v216_v18, 0.0  ;;  %v984_v25 = vmax.f32 %v217_v24, 0.0  ;;  %v988_v29 = vmax.f32 %v218_v27, 0.0  ;;  %v409_v15 = vld [vmem:[%s1293_s2 + $0x250] sm:$0xff]  ;;  %v408_v24 = vld [vmem:[%s1293_s2 + $0x248] sm:$0xff] }
 0x1a3   :  { %v546_v18 = vld [vmem:[%s1293_s2 + $0x3d0] sm:$0xff]  ;;  %420 = vmatpush.msrb.mxu1 %v409_v15  ;;  %467 = vmatpush.msrb.mxu3 %v456_v17  ;;  %v545_v27 = vld [vmem:[%s1293_s2 + $0x3c8] sm:$0xff] }
 0x1a4   :  { %255 = vmatmul.f32.vlgmr.msra.gmra.mxu3 %v974_v16  ;;  %302 = vmatmul.f32.vlgmr.msrb.gmra.mxu2 %v974_v16  ;;  %v529_v15 = vld [vmem:[%s1293_s2 + $0x348] sm:$0xff] }
 0x1a5   :  { %421 = vmatpush.msrb.mxu1 %v408_v24  ;;  %468 = vmatpush.msrb.mxu3 %v455_v26  ;;  %v528_v24 = vld [vmem:[%s1293_s2 + $0x340] sm:$0xff] }
 0x1ac   :  { %258 = vmatmul.f32.gmra.mxu3 %v979_v21  ;;  %305 = vmatmul.f32.gmra.mxu2 %v979_v21 }
 0x1b4   :  { %261 = vmatmul.f32.gmra.mxu3 %v984_v25  ;;  %308 = vmatmul.f32.gmra.mxu2 %v984_v25 }
 0x1bc   :  { %264 = vmatmul.f32.gmra.mxu3 %v988_v29  ;;  %311 = vmatmul.f32.gmra.mxu2 %v988_v29 }
 0x227   :  { %v256_v28 = vpop.f32.mrf.mxu3  ;;  %v303_v35 = vpop.f32.mrf.mxu2 }
 0x22f   :  { %v259_v30 = vpop.f32.mrf.mxu3  ;;  %v306_v37 = vpop.f32.mrf.mxu2 }
 0x230   :  { %v268_v34 = vpack.c.bf16 %v259_v30, %v256_v28 }
 0x237   :  { %v262_v32 = vpop.f32.mrf.mxu3  ;;  %v309_v39 = vpop.f32.mrf.mxu2 }
 0x23f   :  { %v265_v33 = vpop.f32.mrf.mxu3  ;;  %v312_v50 = vpop.f32.mrf.mxu2 }
 0x240   :  { %v269_v31 = vpack.c.bf16 %v265_v33, %v262_v32  ;;  %v407_v33 = vld [vmem:[%s1293_s2 + $0x240] sm:$0xff] }
 0x241   :  { %422 = vmatpush.msrb.mxu1 %v407_v33 }
 0x242   :  { %321 = vmatpush.bf16.msrb.mxu0 %v269_v31  ;;  %v454_v31 = vld [vmem:[%s1293_s2 + $0x2c0] sm:$0xff] }
 0x243   :  { %469 = vmatpush.msrb.mxu3 %v454_v31  ;;  %v525_v31 = vld [vmem:[%s1293_s2 + $0x328] sm:$0xff] }
 0x246   :  { %322 = vmatpush.bf16.msrb.mxu0 %v268_v34  ;;  %v544_v34 = vld [vmem:[%s1293_s2 + $0x3c0] sm:$0xff] }
 0x249   :  { %683 = vmatmul.msk.bf16.vlgmr.msrb.gmra.mxu0 %vm125_vm0, %v836_v42 }
 0x24a   :  { %552 = vmatpush.msra.mxu0 %v551_v61  ;;  %v538_v61 = vld [vmem:[%s1293_s2 + $0x390] sm:$0xff] }
 0x24c   :  { %553 = vmatpush.msra.mxu0 %v550_v1  ;;  %v537_v1 = vld [vmem:[%s1293_s2 + $0x388] sm:$0xff] }
 0x24e   :  { %554 = vmatpush.msra.mxu0 %v549_v5  ;;  %v536_v5 = vld [vmem:[%s1293_s2 + $0x380] sm:$0xff] }
 0x250   :  { %555 = vmatpush.msra.mxu0 %v548_v9  ;;  %v534_v9 = vld [vmem:[%s1293_s2 + $0x370] sm:$0xff] }
 0x252   :  { %556 = vmatpush.msra.mxu0 %v547_v13  ;;  %v532_v13 = vld [vmem:[%s1293_s2 + $0x360] sm:$0xff] }
 0x254   :  { %557 = vmatpush.msra.mxu0 %v546_v18 }
 0x256   :  { %558 = vmatpush.msra.mxu0 %v545_v27 }
 0x258   :  { %559 = vmatpush.msra.mxu0 %v544_v34 }
 0x259   :  { %684 = vmatmul.msk.bf16.gmra.mxu0 %vm125_vm0, %v843_v43 }
 0x2c6   :  { %v324_v36 = vpop.f32.mrf.mxu0 }
 0x2c7   :  { %v325_v44 = vadd.f32 %v324_v36, %v303_v35 }
 0x2c9   :  { %v336_v48 = vadd.f32 %v693_v45, %v325_v44  ;;  %v405_v44 = vld [vmem:[%s1293_s2 + $0x230] sm:$0xff] }
 0x2ce   :  { %v326_v38 = vpop.f32.mrf.mxu0 }
 0x2cf   :  { %v327_v41 = vadd.f32 %v326_v38, %v306_v37  ;;  %v406_v37 = vld [vmem:[%s1293_s2 + $0x238] sm:$0xff] }
 0x2d0   :  { %v453_v38 = vld [vmem:[%s1293_s2 + $0x2b8] sm:$0xff]  ;;  %423 = vmatpush.msrb.mxu1 %v406_v37 }
 0x2d1   :  { %v337_v47 = vadd.f32 %v693_v45, %v327_v41  ;;  %470 = vmatpush.msrb.mxu3 %v453_v38 }
 0x2d2   :  { %424 = vmatpush.msrb.mxu1 %v405_v44 }
 0x2d3   :  { %v340_v52 = vadd.f32 %v337_v47, %v336_v48 }
 0x2d6   :  { %v329_v40 = vpop.f32.mrf.mxu0 }
 0x2d7   :  { %v330_v46 = vadd.f32 %v329_v40, %v309_v39  ;;  %v543_v39 = vld [vmem:[%s1293_s2 + $0x3b8] sm:$0xff] }
 0x2d8   :  { %560 = vmatpush.msra.mxu0 %v543_v39  ;;  %v695_v39 = vld [vmem:[%s1293_s2 + $0x486] ss:$0 sm:$0xff] }
 0x2d9   :  { %v338_v49 = vadd.f32 %v693_v45, %v330_v46  ;;  %v542_v46 = vld [vmem:[%s1293_s2 + $0x3b0] sm:$0xff] }
 0x2da   :  { %561 = vmatpush.msra.mxu0 %v542_v46 }
 0x2db   :  { %v341_v54 = vadd.f32 %v340_v52, %v338_v49  ;;  %v403_v52 = vld [vmem:[%s1293_s2 + $0x220] sm:$0xff] }
 0x2de   :  { %v331_v51 = vpop.f32.mrf.mxu0 }
 0x2df   :  { %v332_v53 = vadd.f32 %v331_v51, %v312_v50  ;;  %v541_v50 = vld [vmem:[%s1293_s2 + $0x3a8] sm:$0xff] }
 0x2e0   :  { %562 = vmatpush.msra.mxu0 %v541_v50 }
 0x2e1   :  { %v339_v55 = vadd.f32 %v693_v45, %v332_v53  ;;  %v452_v45 = vld [vmem:[%s1293_s2 + $0x2b0] sm:$0xff]  ;;  %v450_v53 = vld [vmem:[%s1293_s2 + $0x2a0] sm:$0xff] }
 0x2e2   :  { %471 = vmatpush.msrb.mxu3 %v452_v45 }
 0x2e3   :  { %v342_v56 = vadd.f32 %v341_v54, %v339_v55  ;;  %v540_v54 = vld [vmem:[%s1293_s2 + $0x3a0] sm:$0xff] }
 0x2e4   :  { %563 = vmatpush.msra.mxu0 %v540_v54 }
 0x2e5   :  { %v343_v57 = vrot.slane %v342_v56, 4 }
 0x2e7   :  { %v344_v58 = vadd.f32 %v343_v57, %v342_v56  ;;  %v402_v56 = vld [vmem:[%s1293_s2 + $0x218] sm:$0xff] }
 0x2e8   :  { %v449_v57 = vld [vmem:[%s1293_s2 + $0x298] sm:$0xff] }
 0x2e9   :  { %v345_v62 = vrot.slane %v344_v58, 2 }
 0x2eb   :  { %v346_v2 = vadd.f32 %v345_v62, %v344_v58  ;;  %v539_v58 = vld [vmem:[%s1293_s2 + $0x398] sm:$0xff] }
 0x2ec   :  { %564 = vmatpush.msra.mxu0 %v539_v58 }
 0x2ed   :  { %v347_v6 = vrot.slane %v346_v2, 1 }
 0x2ee   :  { %565 = vmatpush.msra.mxu0 %v538_v61 }
 0x2ef   :  { %v348_v10 = vadd.f32 %v347_v6, %v346_v2 }
 0x2f0   :  { %566 = vmatpush.msra.mxu0 %v537_v1  ;;  %v619_v1 = vld [vmem:[%s1293_s2 + $0x448] sm:$0xff] }
 0x2f1   :  { %v349_v14 = vmul.f32 %v348_v10, %v874_v19 }
 0x2f2   :  { %567 = vmatpush.msra.mxu0 %v536_v5  ;;  %v614_v5 = vld [vmem:[%s1293_s2 + $0x420] sm:$0xff] }
 0x2f3   :  { %v1054_v20 = vsub.f32 %v336_v48, %v349_v14  ;;  %v1056_v22 = vsub.f32 %v337_v47, %v349_v14  ;;  %v1058_v23 = vsub.f32 %v338_v49, %v349_v14  ;;  %v1069_v28 = vsub.f32 %v339_v55, %v349_v14  ;;  %v404_v48 = vld [vmem:[%s1293_s2 + $0x228] sm:$0xff]  ;;  %v531_v14 = vld [vmem:[%s1293_s2 + $0x358] sm:$0xff] }
 0x2f4   :  { %v451_v49 = vld [vmem:[%s1293_s2 + $0x2a8] sm:$0xff]  ;;  %425 = vmatpush.msrb.mxu1 %v404_v48 }
 0x2f5   :  { %v354_v30 = vmul.f32 %v1054_v20, %v1054_v20  ;;  %v355_v32 = vmul.f32 %v1056_v22, %v1056_v22  ;;  %v356_v35 = vmul.f32 %v1058_v23, %v1058_v23  ;;  %v357_v40 = vmul.f32 %v1069_v28, %v1069_v28  ;;  %472 = vmatpush.msrb.mxu3 %v451_v49  ;;  %v520_v49 = vld [vmem:[%s1293_s2 + $0x300] sm:$0xff] }
 0x2f6   :  { %426 = vmatpush.msrb.mxu1 %v403_v52 }
 0x2f7   :  { %v358_v36 = vadd.f32 %v355_v32, %v354_v30  ;;  %473 = vmatpush.msrb.mxu3 %v450_v53  ;;  %v527_v30 = vld [vmem:[%s1293_s2 + $0x338] sm:$0xff]  ;;  %v526_v32 = vld [vmem:[%s1293_s2 + $0x330] sm:$0xff] }
 0x2f8   :  { %427 = vmatpush.msrb.mxu1 %v402_v56 }
 0x2f9   :  { %v359_v41 = vadd.f32 %v358_v36, %v356_v35  ;;  %474 = vmatpush.msrb.mxu3 %v449_v57  ;;  %v524_v35 = vld [vmem:[%s1293_s2 + $0x320] sm:$0xff] }
 0x2fa   :  { %428 = vmatpush.msrb.mxu1 %v401_v59  ;;  %v694_v36 = vld [vmem:[%s1293_s2 + $0x485] ss:$0 sm:$0xff] }
 0x2fb   :  { %v360_v47 = vadd.f32 %v359_v41, %v357_v40  ;;  %475 = vmatpush.msrb.mxu3 %v448_v60  ;;  %v523_v40 = vld [vmem:[%s1293_s2 + $0x318] sm:$0xff]  ;;  %v522_v41 = vld [vmem:[%s1293_s2 + $0x310] sm:$0xff] }
 0x2fc   :  { %429 = vmatpush.msrb.mxu1 %v400_v63  ;;  %v624_v63 = vld [vmem:[%s1293_s2 + $0x470] sm:$0xff] }
 0x2fd   :  { %v361_v51 = vrot.slane %v360_v47, 4  ;;  %476 = vmatpush.msrb.mxu3 %v447_v0  ;;  %v620_v0 = vld [vmem:[%s1293_s2 + $0x450] sm:$0xff] }
 0x2fe   :  { %430 = vmatpush.msrb.mxu1 %v399_v3  ;;  %v617_v3 = vld [vmem:[%s1293_s2 + $0x438] sm:$0xff] }
 0x2ff   :  { %v362_v55 = vadd.f32 %v361_v51, %v360_v47  ;;  %477 = vmatpush.msrb.mxu3 %v446_v4  ;;  %v615_v4 = vld [vmem:[%s1293_s2 + $0x428] sm:$0xff] }
 0x300   :  { %581 = vmatpush.msra.mxu1 %v535_v8  ;;  %v611_v8 = vld [vmem:[%s1293_s2 + $0x408] sm:$0xff] }
 0x301   :  { %v363_v62 = vrot.slane %v362_v55, 2 }
 0x302   :  { %582 = vmatpush.msra.mxu1 %v534_v9  ;;  %v610_v9 = vld [vmem:[%s1293_s2 + $0x400] sm:$0xff] }
 0x303   :  { %v364_v2 = vadd.f32 %v363_v62, %v362_v55  ;;  %v625_v62 = vld [vmem:[%s1293_s2 + $0x478] sm:$0xff] }
 0x304   :  { %583 = vmatpush.msra.mxu1 %v533_v11  ;;  %626 = vmatpush.msra.mxu3 %v625_v62 }
 0x305   :  { %v365_v6 = vrot.slane %v364_v2, 1 }
 0x306   :  { %584 = vmatpush.msra.mxu1 %v532_v13  ;;  %627 = vmatpush.msra.mxu3 %v624_v63 }
 0x307   :  { %v366_v7 = vadd.f32 %v365_v6, %v364_v2  ;;  %v618_v2 = vld [vmem:[%s1293_s2 + $0x440] sm:$0xff]  ;;  %v613_v6 = vld [vmem:[%s1293_s2 + $0x418] sm:$0xff] }
 0x308   :  { %585 = vmatpush.msra.mxu1 %v531_v14 }
 0x309   :  { %v367_v10 = vmul.f32 %v366_v7, %v874_v19  ;;  %v530_v19 = vld [vmem:[%s1293_s2 + $0x350] sm:$0xff] }
 0x30a   :  { %586 = vmatpush.msra.mxu1 %v530_v19  ;;  %v612_v7 = vld [vmem:[%s1293_s2 + $0x410] sm:$0xff] }
 0x30b   :  { %v368_v12 = vadd.f32 1e-05, %v367_v10  ;;  %v696_v10 = vld [vmem:[%s1293_s2 + $0x482] ss:$0 sm:$0xff] }
 0x30c   :  { %587 = vmatpush.msra.mxu1 %v529_v15 }
 0x30d   :  { %702 = vrsqrt.f32 %v368_v12  ;;  %vm375_vm6 = vweird.f32 %v368_v12 }
 0x30e   :  { %588 = vmatpush.msra.mxu1 %v528_v24 }
 0x310   :  { %589 = vmatpush.msra.mxu1 %v527_v30 }
 0x312   :  { %590 = vmatpush.msra.mxu1 %v526_v32 }
 0x313   :  { %v703_v17 = vpop.eup %702 }
 0x314   :  { %v370_v18 = vmul.f32 %v703_v17, %v368_v12  ;;  %vm376_vm5 = vweird.f32 %v703_v17  ;;  %591 = vmatpush.msra.mxu1 %v525_v31 }
 0x315   :  { %vm377_vm7 = vmor %vm375_vm6, %vm376_vm5 }
 0x316   :  { %v371_v26 = vmul.f32 %v703_v17, %v370_v18  ;;  %592 = vmatpush.msra.mxu1 %v524_v35 }
 0x318   :  { %v372_v27 = vmul.f32 0.5, %v371_v26  ;;  %593 = vmatpush.msra.mxu1 %v523_v40 }
 0x31a   :  { %v373_v33 = vsub.f32 1.5, %v372_v27  ;;  %594 = vmatpush.msra.mxu1 %v522_v41  ;;  %v697_v41 = vld [vmem:[%s1293_s2 + $0x487] ss:$0 sm:$0xff] }
 0x31c   :  { %v374_v34 = vmul.f32 %v703_v17, %v373_v33 }
 0x31e   :  { %v378_v37 = vsel %vm377_vm7, %v703_v17, %v374_v34 }
 0x31f   :  { %v379_v38 = vmul.f32 %v378_v37, %v1054_v20  ;;  %v380_v45 = vmul.f32 %v378_v37, %v1056_v22  ;;  %v521_v20 = vld [vmem:[%s1293_s2 + $0x308] sm:$0xff]  ;;  %v381_v22 = vmul.f32 %v378_v37, %v1058_v23  ;;  %v382_v53 = vmul.f32 %v378_v37, %v1069_v28 }
 0x320   :  { %595 = vmatpush.msra.mxu1 %v521_v20 }
 0x321   :  { %v385_v44 = vmul.f32 %v694_v36, %v379_v38  ;;  %v386_v48 = vmul.f32 %v694_v36, %v380_v45  ;;  %v387_v52 = vmul.f32 %v694_v36, %v381_v22  ;;  %v388_v56 = vmul.f32 %v694_v36, %v382_v53 }
 0x322   :  { %596 = vmatpush.msra.mxu1 %v520_v49 }
 0x323   :  { %v391_v46 = vadd.f32 %v695_v39, %v385_v44  ;;  %v392_v50 = vadd.f32 %v695_v39, %v386_v48  ;;  %v393_v54 = vadd.f32 %v695_v39, %v387_v52  ;;  %v394_v57 = vadd.f32 %v695_v39, %v388_v56 }
 0x325   :  { %v395_v47 = vmax.f32 %v391_v46, 0.0  ;;  %v396_v51 = vmax.f32 %v392_v50, 0.0  ;;  %v397_v55 = vmax.f32 %v393_v54, 0.0  ;;  %v398_v58 = vmax.f32 %v394_v57, 0.0 }
 0x327   :  { %431 = vmatmul.f32.vlgmr.msrb.gmra.mxu1 %v395_v47  ;;  %478 = vmatmul.f32.vlgmr.msrb.gmra.mxu3 %v395_v47 }
 0x328   :  { %568 = vmatmul.f32.vlgmr.msra.gmra.mxu0 %v395_v47 }
 0x32f   :  { %434 = vmatmul.f32.gmra.mxu1 %v396_v51  ;;  %481 = vmatmul.f32.gmra.mxu3 %v396_v51 }
 0x330   :  { %571 = vmatmul.f32.gmra.mxu0 %v396_v51 }
 0x337   :  { %437 = vmatmul.f32.gmra.mxu1 %v397_v55  ;;  %484 = vmatmul.f32.gmra.mxu3 %v397_v55 }
 0x338   :  { %574 = vmatmul.f32.gmra.mxu0 %v397_v55 }
 0x33f   :  { %440 = vmatmul.f32.gmra.mxu1 %v398_v58  ;;  %487 = vmatmul.f32.gmra.mxu3 %v398_v58 }
 0x340   :  { %577 = vmatmul.f32.gmra.mxu0 %v398_v58 }
 0x347   :  { %597 = vmatmul.f32.vlgmr.msra.gmra.mxu1 %v974_v16  ;;  %v623_v16 = vld [vmem:[%s1293_s2 + $0x468] sm:$0xff] }
 0x348   :  { %628 = vmatpush.msra.mxu3 %v623_v16 }
 0x34f   :  { %600 = vmatmul.f32.gmra.mxu1 %v979_v21 }
 0x357   :  { %603 = vmatmul.f32.gmra.mxu1 %v984_v25  ;;  %v622_v25 = vld [vmem:[%s1293_s2 + $0x460] sm:$0xff] }
 0x358   :  { %629 = vmatpush.msra.mxu3 %v622_v25 }
 0x35f   :  { %606 = vmatmul.f32.gmra.mxu1 %v988_v29  ;;  %v621_v29 = vld [vmem:[%s1293_s2 + $0x458] sm:$0xff] }
 0x360   :  { %630 = vmatpush.msra.mxu3 %v621_v29 }
 0x362   :  { %631 = vmatpush.msra.mxu3 %v620_v0 }
 0x364   :  { %632 = vmatpush.msra.mxu3 %v619_v1 }
 0x366   :  { %633 = vmatpush.msra.mxu3 %v618_v2 }
 0x368   :  { %634 = vmatpush.msra.mxu3 %v617_v3 }
 0x3a4   :  { %v432_v23 = vpop.f32.mrf.mxu1 }
 0x3a5   :  { %v569_v39 = vpop.f32.mrf.mxu0 }
 0x3ac   :  { %v435_v28 = vpop.f32.mrf.mxu1 }
 0x3ad   :  { %v444_v21 = vpack.c.bf16 %v435_v28, %v432_v23  ;;  %v572_v46 = vpop.f32.mrf.mxu0 }
 0x3b4   :  { %v438_v59 = vpop.f32.mrf.mxu1 }
 0x3b5   :  { %v575_v52 = vpop.f32.mrf.mxu0 }
 0x3bc   :  { %v441_v60 = vpop.f32.mrf.mxu1 }
 0x3bd   :  { %v445_v61 = vpack.c.bf16 %v441_v60, %v438_v59  ;;  %v578_v58 = vpop.f32.mrf.mxu0 }
 0x3bf   :  { %497 = vmatpush.bf16.msra.mxu2 %v445_v61 }
 0x3c3   :  { %498 = vmatpush.bf16.msra.mxu2 %v444_v21 }
 0x3c4   :  { %v598_v38 = vpop.f32.mrf.mxu1 }
 0x3c5   :  { %v599_v40 = vadd.f32 %v598_v38, %v569_v39 }
 0x3c6   :  { %685 = vmatmul.msk.bf16.vlgmr.msra.gmra.mxu2 %vm125_vm0, %v836_v42  ;;  %v616_v42 = vld [vmem:[%s1293_s2 + $0x430] sm:$0xff] }
 0x3c7   :  { %635 = vmatpush.msra.mxu3 %v616_v42 }
 0x3c9   :  { %636 = vmatpush.msra.mxu3 %v615_v4 }
 0x3cb   :  { %637 = vmatpush.msra.mxu3 %v614_v5 }
 0x3cc   :  { %v601_v44 = vpop.f32.mrf.mxu1 }
 0x3cd   :  { %638 = vmatpush.msra.mxu3 %v613_v6  ;;  %v602_v48 = vadd.f32 %v601_v44, %v572_v46 }
 0x3cf   :  { %639 = vmatpush.msra.mxu3 %v612_v7 }
 0x3d1   :  { %640 = vmatpush.msra.mxu3 %v611_v8 }
 0x3d3   :  { %641 = vmatpush.msra.mxu3 %v610_v9 }
 0x3d4   :  { %v604_v22 = vpop.f32.mrf.mxu1 }
 0x3d5   :  { %v605_v53 = vadd.f32 %v604_v22, %v575_v52 }
 0x3d6   :  { %686 = vmatmul.msk.bf16.gmra.mxu2 %vm125_vm0, %v843_v43  ;;  %v479_v43 = vpop.f32.mrf.mxu3 }
 0x3dc   :  { %v607_v57 = vpop.f32.mrf.mxu1 }
 0x3dd   :  { %v608_v23 = vadd.f32 %v607_v57, %v578_v58 }
 0x3de   :  { %v482_v14 = vpop.f32.mrf.mxu3 }
 0x3e6   :  { %v485_v26 = vpop.f32.mrf.mxu3 }
 0x3ee   :  { %v488_v31 = vpop.f32.mrf.mxu3 }
 0x449   :  { %v500_v11 = vpop.f32.mrf.mxu2 }
 0x44a   :  { %v501_v12 = vadd.f32 %v500_v11, %v479_v43 }
 0x44c   :  { %v512_v13 = vadd.f32 %v696_v10, %v501_v12 }
 0x44e   :  { %v516_v19 = vmax.f32 %v512_v13, 0.0 }
 0x450   :  { %642 = vmatmul.f32.vlgmr.msra.gmra.mxu3 %v516_v19 }
 0x451   :  { %v502_v15 = vpop.f32.mrf.mxu2 }
 0x452   :  { %v503_v17 = vadd.f32 %v502_v15, %v482_v14 }
 0x454   :  { %v513_v18 = vadd.f32 %v696_v10, %v503_v17 }
 0x456   :  { %v517_v24 = vmax.f32 %v513_v18, 0.0 }
 0x458   :  { %645 = vmatmul.f32.gmra.mxu3 %v517_v24 }
 0x459   :  { %v505_v27 = vpop.f32.mrf.mxu2 }
 0x45a   :  { %v506_v30 = vadd.f32 %v505_v27, %v485_v26 }
 0x45c   :  { %v514_v32 = vadd.f32 %v696_v10, %v506_v30 }
 0x45e   :  { %v518_v33 = vmax.f32 %v514_v32, 0.0 }
 0x460   :  { %648 = vmatmul.f32.gmra.mxu3 %v518_v33 }
 0x461   :  { %v507_v34 = vpop.f32.mrf.mxu2 }
 0x462   :  { %v508_v35 = vadd.f32 %v507_v34, %v488_v31 }
 0x464   :  { %v515_v36 = vadd.f32 %v696_v10, %v508_v35 }
 0x466   :  { %v519_v37 = vmax.f32 %v515_v36, 0.0 }
 0x468   :  { %651 = vmatmul.f32.gmra.mxu3 %v519_v37 }
 0x4d3   :  { %v643_v45 = vpop.f32.mrf.mxu3 }
 0x4d4   :  { %v655_v20 = vadd.f32 %v643_v45, %v599_v40 }
 0x4d6   :  { %v661_v47 = vadd.f32 %v697_v41, %v655_v20 }
 0x4d8   :  { %665 = vst [vmem:[%s1296_s3] sm:$0xff] %v661_v47 }
 0x4db   :  { %v646_v49 = vpop.f32.mrf.mxu3 }
 0x4dc   :  { %v656_v50 = vadd.f32 %v646_v49, %v602_v48 }
 0x4de   :  { %v662_v51 = vadd.f32 %v697_v41, %v656_v50 }
 0x4e0   :  { %666 = vst [vmem:[%s1296_s3 + $0x8] sm:$0xff] %v662_v51 }
 0x4e3   :  { %v649_v54 = vpop.f32.mrf.mxu3 }
 0x4e4   :  { %v657_v55 = vadd.f32 %v649_v54, %v605_v53 }
 0x4e6   :  { %v663_v56 = vadd.f32 %v697_v41, %v657_v55 }
 0x4e8   :  { %667 = vst [vmem:[%s1296_s3 + $0x10] sm:$0xff] %v663_v56 }
 0x4eb   :  { %v652_v28 = vpop.f32.mrf.mxu3 }
 0x4ec   :  { %v658_v59 = vadd.f32 %v652_v28, %v608_v23 }
 0x4ee   :  { %v664_v60 = vadd.f32 %v697_v41, %v658_v59 }
 0x4f0   :  { %668 = vst [vmem:[%s1296_s3 + $0x18] sm:$0xff] %v664_v60 }

</bundles_post_ra>
